<compile_context>
chip_gen: v5e
topology: v5e:2x2
jax: 0.10.0
libtpu: 0.0.40
codegen_flags: <defaults>
</compile_context>

<pallas_src>
import functools

import jax
import jax.numpy as jnp
from jax.experimental import pallas as pl
from jax.experimental.pallas import tpu as pltpu

LANES = 128


def _round_up(n, m):
    return -(-n // m) * m


# --------------------------------------------------------------------------
# Kernel
# --------------------------------------------------------------------------
def _cvae_kernel(in_ref, w_ref, b_ref, out_ref, *, dims, wrow, brow, tb):
    IN, L, H, FD = dims["inp"], dims["lat"], dims["hid"], dims["fwd"]
    f32 = jnp.float32
    relu = lambda v: jnp.maximum(v, 0.0)

    xin = in_ref[...]                       # (tb, 128) lane-dense input slab
    x = xin[:, 0:IN]
    y = xin[:, IN:IN + FD]
    eps = xin[:, IN + FD:IN + FD + L]

    def bias(row, n):
        return b_ref[row:row + 1, :n]       # (1, n), broadcasts over batch

    def mm(a, row, k, n, brow_i):
        # MXU matmul against a static slice of the weight slab.
        w = w_ref[row:row + k, :n]
        return jnp.dot(a, w, preferred_element_type=f32) + bias(brow_i, n)

    def fma(a, row, k, n, acc):
        # tiny-K contraction on the VPU: acc += sum_i a[:, i] * w[row+i, :n]
        for i in range(k):
            acc = acc + a[:, i:i + 1] * w_ref[row + i:row + i + 1, :n]
        return acc

    # ---- forward_net(y) -> x_hat  (first layer K=FD -> VPU FMA) -----------
    h = relu(fma(y, wrow["wf1"], FD, H, bias(brow["bf1"], H)))
    h = relu(mm(h, wrow["wf2"], H, H, brow["bf2"]))
    h = relu(mm(h, wrow["wf3"], H, H, brow["bf3"]))
    x_hat = mm(h, wrow["wf4"], H, IN, brow["bf4"])

    # ---- encoder(cat(x, y)) : split-weight concat ---------------------------
    e = (jnp.dot(x, w_ref[wrow["we1x"]:wrow["we1x"] + IN, :H],
                 preferred_element_type=f32)
         + bias(brow["be1"], H))
    e = relu(fma(y, wrow["we1y"], FD, H, e))
    e = relu(mm(e, wrow["we2"], H, H, brow["be2"]))
    e = relu(mm(e, wrow["we3"], H, H, brow["be3"]))

    # ---- fused mu|logvar head (single (H, 2L) matmul) -----------------------
    ml = mm(e, wrow["whead"], H, 2 * L, brow["bhead"])      # (tb, 2L)
    mu = ml[:, :L]
    logvar = ml[:, L:]

    # ---- reparameterize ------------------------------------------------------
    z = mu + eps * jnp.exp(0.5 * logvar)

    # ---- decoder(cat(z, y)) : split-weight concat, K=L and K=FD on VPU ------
    d = fma(z, wrow["wd1z"], L, H, bias(brow["bd1"], H))
    d = relu(fma(y, wrow["wd1y"], FD, H, d))
    d = relu(mm(d, wrow["wd2"], H, H, brow["bd2"]))
    d = relu(mm(d, wrow["wd3"], H, H, brow["bd3"]))
    recon = mm(d, wrow["wd4"], H, IN, brow["bd4"])

    # ---- single lane-dense (tb, 128) unmasked store --------------------------
    used = 2 * IN + 2 * L
    tail = jnp.zeros((tb, LANES - used), f32)
    # layout: recon[0:IN] | mu[IN:IN+L] | logvar[IN+L:IN+2L] | x_hat[IN+2L:2IN+2L]
    out_ref[...] = jnp.concatenate([recon, ml, x_hat, tail], axis=1)


# --------------------------------------------------------------------------
# Slab packing (wrapper-side, plain XLA)
# --------------------------------------------------------------------------
def _pack_slabs(params, IN, L):
    """Pack all weights into one (rows, 128) slab (8-row-aligned blocks) and
    all biases into one (16, 128) slab.  Returns (w_slab, b_slab, wrow, brow)."""
    we1, wd1 = params["we1"], params["wd1"]
    weights = [
        ("wf1", params["wf1"]), ("wf2", params["wf2"]),
        ("wf3", params["wf3"]), ("wf4", params["wf4"]),
        ("we1x", we1[:IN]), ("we1y", we1[IN:]),
        ("we2", params["we2"]), ("we3", params["we3"]),
        ("whead", jnp.concatenate([params["wmu"], params["wlv"]], axis=1)),
        ("wd1z", wd1[:L]), ("wd1y", wd1[L:]),
        ("wd2", params["wd2"]), ("wd3", params["wd3"]), ("wd4", params["wd4"]),
    ]
    wrow, blocks, row = {}, [], 0
    for name, w in weights:
        r, c = w.shape
        rp = _round_up(r, 8)
        wrow[name] = row
        blk = jnp.zeros((rp, LANES), jnp.float32).at[:r, :c].set(
            w.astype(jnp.float32))
        blocks.append(blk)
        row += rp
    w_slab = jnp.concatenate(blocks, axis=0)

    biases = [
        ("bf1", params["bf1"]), ("bf2", params["bf2"]),
        ("bf3", params["bf3"]), ("bf4", params["bf4"]),
        ("be1", params["be1"]), ("be2", params["be2"]), ("be3", params["be3"]),
        ("bhead", jnp.concatenate([params["bmu"], params["blv"]], axis=0)),
        ("bd1", params["bd1"]), ("bd2", params["bd2"]),
        ("bd3", params["bd3"]), ("bd4", params["bd4"]),
    ]
    brow = {}
    b_slab = jnp.zeros((_round_up(len(biases), 8), LANES), jnp.float32)
    for i, (name, b) in enumerate(biases):
        brow[name] = i
        b = b.reshape(-1).astype(jnp.float32)
        b_slab = b_slab.at[i, :b.shape[0]].set(b)
    return w_slab, b_slab, wrow, brow


# --------------------------------------------------------------------------
# Forward wrapper
# --------------------------------------------------------------------------
def cvae_gsnn1_forward(x, y, eps, params, *, batch_tile=None):
    """Fused forward pass. Returns (recon_x, mu, logvar, x_hat)."""
    B, IN = x.shape
    FD = y.shape[1]
    L = eps.shape[1]
    H = params["wf1"].shape[1]

    w_slab, b_slab, wrow, brow = _pack_slabs(params, IN, L)

    # Lane-dense input slab: [x | y | eps | 0-pad] -> (B, 128)
    in_used = IN + FD + L
    in_slab = jnp.concatenate(
        [x, y, eps, jnp.zeros((B, LANES - in_used), jnp.float32)], axis=1)

    # Batch tiling over a parallel grid axis (megacore-shardable on v7x).
    TB = batch_tile or min(_round_up(B, 8), 256)
    Bp = _round_up(B, TB)
    if Bp != B:
        in_slab = jnp.pad(in_slab, ((0, Bp - B), (0, 0)))
    grid = (Bp // TB,)

    WR, BR = w_slab.shape[0], b_slab.shape[0]

    kernel = functools.partial(
        _cvae_kernel,
        dims=dict(inp=IN, lat=L, hid=H, fwd=FD),
        wrow=wrow, brow=brow, tb=TB)

    flops_per_row = 2 * (
        FD * H + 2 * H * H + H * IN            # forward_net
        + (IN + FD) * H + 2 * H * H            # encoder
        + H * 2 * L                            # fused heads
        + (L + FD) * H + 2 * H * H + H * IN)   # decoder
    cost = pl.CostEstimate(
        flops=int(flops_per_row) * int(Bp),
        transcendentals=int(Bp) * int(L),
        bytes_accessed=4 * (in_slab.size + Bp * LANES
                            + w_slab.size + b_slab.size))

    out = pl.pallas_call(
        kernel,
        out_shape=jax.ShapeDtypeStruct((Bp, LANES), jnp.float32),
        grid=grid,
        in_specs=[
            pl.BlockSpec((TB, LANES), lambda i: (i, 0)),   # input slab (tiled)
            pl.BlockSpec((WR, LANES), lambda i: (0, 0)),   # weight slab (resident)
            pl.BlockSpec((BR, LANES), lambda i: (0, 0)),   # bias slab (resident)
        ],
        out_specs=pl.BlockSpec((TB, LANES), lambda i: (i, 0)),
        compiler_params=pltpu.CompilerParams(
            dimension_semantics=("parallel",)),
        cost_estimate=cost,
    )(in_slab, w_slab, b_slab)

    recon = out[:B, 0:IN]
    mu = out[:B, IN:IN + L]
    logvar = out[:B, IN + L:IN + 2 * L]
    x_hat = out[:B, IN + 2 * L:2 * IN + 2 * L]
    return recon, mu, logvar, x_hat


# --------------------------------------------------------------------------
# Parameter init (PyTorch nn.Linear default) and pure-JAX reference
# --------------------------------------------------------------------------
def _linear_init(key, fan_in, fan_out):
    kw, kb = jax.random.split(key)
    bound = 1.0 / jnp.sqrt(jnp.float32(fan_in))
    w = jax.random.uniform(kw, (fan_in, fan_out), jnp.float32, -bound, bound)
    b = jax.random.uniform(kb, (fan_out,), jnp.float32, -bound, bound)
    return w, b


def init_params(key, input_size, latent_dim, hidden_dim, forward_dim):
    ks = jax.random.split(key, 13)
    p = {}
    p["wf1"], p["bf1"] = _linear_init(ks[0], forward_dim, hidden_dim)
    p["wf2"], p["bf2"] = _linear_init(ks[1], hidden_dim, hidden_dim)
    p["wf3"], p["bf3"] = _linear_init(ks[2], hidden_dim, hidden_dim)
    p["wf4"], p["bf4"] = _linear_init(ks[3], hidden_dim, input_size)
    p["we1"], p["be1"] = _linear_init(ks[4], input_size + forward_dim, hidden_dim)
    p["we2"], p["be2"] = _linear_init(ks[5], hidden_dim, hidden_dim)
    p["we3"], p["be3"] = _linear_init(ks[6], hidden_dim, hidden_dim)
    p["wmu"], p["bmu"] = _linear_init(ks[7], hidden_dim, latent_dim)
    p["wlv"], p["blv"] = _linear_init(ks[8], hidden_dim, latent_dim)
    p["wd1"], p["bd1"] = _linear_init(ks[9], latent_dim + forward_dim, hidden_dim)
    p["wd2"], p["bd2"] = _linear_init(ks[10], hidden_dim, hidden_dim)
    p["wd3"], p["bd3"] = _linear_init(ks[11], hidden_dim, hidden_dim)
    p["wd4"], p["bd4"] = _linear_init(ks[12], hidden_dim, input_size)
    return p


def reference_forward(x, y, eps, p):
    """Pure-JAX reference matching the PyTorch forward semantics."""
    relu = lambda v: jnp.maximum(v, 0.0)
    h = relu(y @ p["wf1"] + p["bf1"])
    h = relu(h @ p["wf2"] + p["bf2"])
    h = relu(h @ p["wf3"] + p["bf3"])
    x_hat = h @ p["wf4"] + p["bf4"]

    xy = jnp.concatenate([x, y], axis=1)
    e = relu(xy @ p["we1"] + p["be1"])
    e = relu(e @ p["we2"] + p["be2"])
    e = relu(e @ p["we3"] + p["be3"])

    mu = e @ p["wmu"] + p["bmu"]
    logvar = e @ p["wlv"] + p["blv"]
    z = mu + eps * jnp.exp(0.5 * logvar)

    zy = jnp.concatenate([z, y], axis=1)
    d = relu(zy @ p["wd1"] + p["bd1"])
    d = relu(d @ p["wd2"] + p["bd2"])
    d = relu(d @ p["wd3"] + p["bd3"])
    recon = d @ p["wd4"] + p["bd4"]
    return recon, mu, logvar, x_hat


if __name__ == "__main__":
    INPUT_SIZE = 16
    LATENT_DIM = 8
    HIDDEN_DIM = 32
    FORWARD_DIM = 2
    BATCH = 8

    key = jax.random.PRNGKey(0)
    kp, kx, ky, keps = jax.random.split(key, 4)

    params = init_params(kp, INPUT_SIZE, LATENT_DIM, HIDDEN_DIM, FORWARD_DIM)
    x = jax.random.normal(kx, (BATCH, INPUT_SIZE), jnp.float32)
    y = jax.random.normal(ky, (BATCH, FORWARD_DIM), jnp.float32)
    # reparameterization noise (torch.randn_like) supplied explicitly
    eps = jax.random.normal(keps, (BATCH, LATENT_DIM), jnp.float32)

    recon, mu, logvar, x_hat = jax.block_until_ready(
        cvae_gsnn1_forward(x, y, eps, params))

    r_recon, r_mu, r_logvar, r_xhat = reference_forward(x, y, eps, params)
    assert jnp.allclose(recon, r_recon, atol=1e-5, rtol=1e-5)
    assert jnp.allclose(mu, r_mu, atol=1e-5, rtol=1e-5)
    assert jnp.allclose(logvar, r_logvar, atol=1e-5, rtol=1e-5)
    assert jnp.allclose(x_hat, r_xhat, atol=1e-5, rtol=1e-5)

    print("KERNEL_OK")
</pallas_src>

<mosaic_0001>
module attributes {stable_mosaic.version = 11 : i64} {
  func.func @_cvae_kernel(%arg0: i32, %arg1: memref<8x128xf32, #tpu.memory_space<vmem>>, %arg2: memref<336x128xf32, #tpu.memory_space<vmem>>, %arg3: memref<16x128xf32, #tpu.memory_space<vmem>>, %arg4: memref<8x128xf32, #tpu.memory_space<vmem>>) attributes {dimension_semantics = [#tpu.dimension_semantics<parallel>], iteration_bounds = array<i64: 1>, scalar_prefetch = 0 : i64, scratch_operands = 0 : i64, tpu.core_type = #tpu.core_type<tc>, window_params = [{transform_indices = @transform_0, window_bounds = array<i64: 8, 128>}, {pipeline_mode = #tpu.pipeline_mode<synchronous>, transform_indices = @transform_1, window_bounds = array<i64: 336, 128>}, {pipeline_mode = #tpu.pipeline_mode<synchronous>, transform_indices = @transform_2, window_bounds = array<i64: 16, 128>}, {transform_indices = @transform_3, window_bounds = array<i64: 8, 128>}]} {
    %c0 = arith.constant 0 : index
    %c0_0 = arith.constant 0 : index
    %0 = vector.load %arg1[%c0, %c0_0] : memref<8x128xf32, #tpu.memory_space<vmem>>, vector<8x128xf32>
    %1 = vector.extract_strided_slice %0 {offsets = [0, 0], sizes = [8, 16], strides = [1, 1]} : vector<8x128xf32> to vector<8x16xf32>
    %2 = vector.extract_strided_slice %0 {offsets = [0, 16], sizes = [8, 2], strides = [1, 1]} : vector<8x128xf32> to vector<8x2xf32>
    %3 = vector.extract_strided_slice %0 {offsets = [0, 18], sizes = [8, 8], strides = [1, 1]} : vector<8x128xf32> to vector<8x8xf32>
    %c0_1 = arith.constant 0 : index
    %c0_2 = arith.constant 0 : index
    %4 = vector.load %arg3[%c0_1, %c0_2] : memref<16x128xf32, #tpu.memory_space<vmem>>, vector<1x32xf32>
    %5 = vector.extract_strided_slice %2 {offsets = [0, 0], sizes = [8, 1], strides = [1, 1]} : vector<8x2xf32> to vector<8x1xf32>
    %c0_3 = arith.constant 0 : index
    %c0_4 = arith.constant 0 : index
    %6 = vector.load %arg2[%c0_3, %c0_4] : memref<336x128xf32, #tpu.memory_space<vmem>>, vector<1x32xf32>
    %7 = vector.broadcast %5 : vector<8x1xf32> to vector<8x32xf32>
    %8 = vector.broadcast %6 : vector<1x32xf32> to vector<8x32xf32>
    %9 = arith.mulf %7, %8 : vector<8x32xf32>
    %10 = vector.broadcast %4 : vector<1x32xf32> to vector<8x32xf32>
    %11 = arith.addf %10, %9 : vector<8x32xf32>
    %12 = vector.extract_strided_slice %2 {offsets = [0, 1], sizes = [8, 1], strides = [1, 1]} : vector<8x2xf32> to vector<8x1xf32>
    %c1 = arith.constant 1 : index
    %c0_5 = arith.constant 0 : index
    %13 = vector.load %arg2[%c1, %c0_5] : memref<336x128xf32, #tpu.memory_space<vmem>>, vector<1x32xf32>
    %14 = vector.broadcast %12 : vector<8x1xf32> to vector<8x32xf32>
    %15 = vector.broadcast %13 : vector<1x32xf32> to vector<8x32xf32>
    %16 = arith.mulf %14, %15 : vector<8x32xf32>
    %17 = arith.addf %11, %16 : vector<8x32xf32>
    %cst = arith.constant 0.000000e+00 : f32
    %18 = vector.broadcast %cst : f32 to vector<8x32xf32>
    %19 = arith.maximumf %17, %18 : vector<8x32xf32>
    %c8 = arith.constant 8 : index
    %c0_6 = arith.constant 0 : index
    %20 = vector.load %arg2[%c8, %c0_6] : memref<336x128xf32, #tpu.memory_space<vmem>>, vector<32x32xf32>
    %cst_7 = arith.constant dense<0.000000e+00> : vector<8x32xf32>
    %21 = tpu.matmul %19, %20, %cst_7 {dimension_numbers = #tpu.dot_dimension_numbers<[1], [0], [0], [1], [0, 0, 1, 1], [], []>} : vector<8x32xf32>, vector<32x32xf32>, vector<8x32xf32> -> vector<8x32xf32>
    %c1_8 = arith.constant 1 : index
    %c0_9 = arith.constant 0 : index
    %22 = vector.load %arg3[%c1_8, %c0_9] : memref<16x128xf32, #tpu.memory_space<vmem>>, vector<1x32xf32>
    %23 = vector.broadcast %22 : vector<1x32xf32> to vector<8x32xf32>
    %24 = arith.addf %21, %23 : vector<8x32xf32>
    %cst_10 = arith.constant 0.000000e+00 : f32
    %25 = vector.broadcast %cst_10 : f32 to vector<8x32xf32>
    %26 = arith.maximumf %24, %25 : vector<8x32xf32>
    %c40 = arith.constant 40 : index
    %c0_11 = arith.constant 0 : index
    %27 = vector.load %arg2[%c40, %c0_11] : memref<336x128xf32, #tpu.memory_space<vmem>>, vector<32x32xf32>
    %cst_12 = arith.constant dense<0.000000e+00> : vector<8x32xf32>
    %28 = tpu.matmul %26, %27, %cst_12 {dimension_numbers = #tpu.dot_dimension_numbers<[1], [0], [0], [1], [0, 0, 1, 1], [], []>} : vector<8x32xf32>, vector<32x32xf32>, vector<8x32xf32> -> vector<8x32xf32>
    %c2 = arith.constant 2 : index
    %c0_13 = arith.constant 0 : index
    %29 = vector.load %arg3[%c2, %c0_13] : memref<16x128xf32, #tpu.memory_space<vmem>>, vector<1x32xf32>
    %30 = vector.broadcast %29 : vector<1x32xf32> to vector<8x32xf32>
    %31 = arith.addf %28, %30 : vector<8x32xf32>
    %cst_14 = arith.constant 0.000000e+00 : f32
    %32 = vector.broadcast %cst_14 : f32 to vector<8x32xf32>
    %33 = arith.maximumf %31, %32 : vector<8x32xf32>
    %c72 = arith.constant 72 : index
    %c0_15 = arith.constant 0 : index
    %34 = vector.load %arg2[%c72, %c0_15] : memref<336x128xf32, #tpu.memory_space<vmem>>, vector<32x16xf32>
    %cst_16 = arith.constant dense<0.000000e+00> : vector<8x16xf32>
    %35 = tpu.matmul %33, %34, %cst_16 {dimension_numbers = #tpu.dot_dimension_numbers<[1], [0], [0], [1], [0, 0, 1, 1], [], []>} : vector<8x32xf32>, vector<32x16xf32>, vector<8x16xf32> -> vector<8x16xf32>
    %c3 = arith.constant 3 : index
    %c0_17 = arith.constant 0 : index
    %36 = vector.load %arg3[%c3, %c0_17] : memref<16x128xf32, #tpu.memory_space<vmem>>, vector<1x16xf32>
    %37 = vector.broadcast %36 : vector<1x16xf32> to vector<8x16xf32>
    %38 = arith.addf %35, %37 : vector<8x16xf32>
    %c104 = arith.constant 104 : index
    %c0_18 = arith.constant 0 : index
    %39 = vector.load %arg2[%c104, %c0_18] : memref<336x128xf32, #tpu.memory_space<vmem>>, vector<16x32xf32>
    %cst_19 = arith.constant dense<0.000000e+00> : vector<8x32xf32>
    %40 = tpu.matmul %1, %39, %cst_19 {dimension_numbers = #tpu.dot_dimension_numbers<[1], [0], [0], [1], [0, 0, 1, 1], [], []>} : vector<8x16xf32>, vector<16x32xf32>, vector<8x32xf32> -> vector<8x32xf32>
    %c4 = arith.constant 4 : index
    %c0_20 = arith.constant 0 : index
    %41 = vector.load %arg3[%c4, %c0_20] : memref<16x128xf32, #tpu.memory_space<vmem>>, vector<1x32xf32>
    %42 = vector.broadcast %41 : vector<1x32xf32> to vector<8x32xf32>
    %43 = arith.addf %40, %42 : vector<8x32xf32>
    %44 = vector.extract_strided_slice %2 {offsets = [0, 0], sizes = [8, 1], strides = [1, 1]} : vector<8x2xf32> to vector<8x1xf32>
    %c120 = arith.constant 120 : index
    %c0_21 = arith.constant 0 : index
    %45 = vector.load %arg2[%c120, %c0_21] : memref<336x128xf32, #tpu.memory_space<vmem>>, vector<1x32xf32>
    %46 = vector.broadcast %44 : vector<8x1xf32> to vector<8x32xf32>
    %47 = vector.broadcast %45 : vector<1x32xf32> to vector<8x32xf32>
    %48 = arith.mulf %46, %47 : vector<8x32xf32>
    %49 = arith.addf %43, %48 : vector<8x32xf32>
    %50 = vector.extract_strided_slice %2 {offsets = [0, 1], sizes = [8, 1], strides = [1, 1]} : vector<8x2xf32> to vector<8x1xf32>
    %c121 = arith.constant 121 : index
    %c0_22 = arith.constant 0 : index
    %51 = vector.load %arg2[%c121, %c0_22] : memref<336x128xf32, #tpu.memory_space<vmem>>, vector<1x32xf32>
    %52 = vector.broadcast %50 : vector<8x1xf32> to vector<8x32xf32>
    %53 = vector.broadcast %51 : vector<1x32xf32> to vector<8x32xf32>
    %54 = arith.mulf %52, %53 : vector<8x32xf32>
    %55 = arith.addf %49, %54 : vector<8x32xf32>
    %cst_23 = arith.constant 0.000000e+00 : f32
    %56 = vector.broadcast %cst_23 : f32 to vector<8x32xf32>
    %57 = arith.maximumf %55, %56 : vector<8x32xf32>
    %c128 = arith.constant 128 : index
    %c0_24 = arith.constant 0 : index
    %58 = vector.load %arg2[%c128, %c0_24] : memref<336x128xf32, #tpu.memory_space<vmem>>, vector<32x32xf32>
    %cst_25 = arith.constant dense<0.000000e+00> : vector<8x32xf32>
    %59 = tpu.matmul %57, %58, %cst_25 {dimension_numbers = #tpu.dot_dimension_numbers<[1], [0], [0], [1], [0, 0, 1, 1], [], []>} : vector<8x32xf32>, vector<32x32xf32>, vector<8x32xf32> -> vector<8x32xf32>
    %c5 = arith.constant 5 : index
    %c0_26 = arith.constant 0 : index
    %60 = vector.load %arg3[%c5, %c0_26] : memref<16x128xf32, #tpu.memory_space<vmem>>, vector<1x32xf32>
    %61 = vector.broadcast %60 : vector<1x32xf32> to vector<8x32xf32>
    %62 = arith.addf %59, %61 : vector<8x32xf32>
    %cst_27 = arith.constant 0.000000e+00 : f32
    %63 = vector.broadcast %cst_27 : f32 to vector<8x32xf32>
    %64 = arith.maximumf %62, %63 : vector<8x32xf32>
    %c160 = arith.constant 160 : index
    %c0_28 = arith.constant 0 : index
    %65 = vector.load %arg2[%c160, %c0_28] : memref<336x128xf32, #tpu.memory_space<vmem>>, vector<32x32xf32>
    %cst_29 = arith.constant dense<0.000000e+00> : vector<8x32xf32>
    %66 = tpu.matmul %64, %65, %cst_29 {dimension_numbers = #tpu.dot_dimension_numbers<[1], [0], [0], [1], [0, 0, 1, 1], [], []>} : vector<8x32xf32>, vector<32x32xf32>, vector<8x32xf32> -> vector<8x32xf32>
    %c6 = arith.constant 6 : index
    %c0_30 = arith.constant 0 : index
    %67 = vector.load %arg3[%c6, %c0_30] : memref<16x128xf32, #tpu.memory_space<vmem>>, vector<1x32xf32>
    %68 = vector.broadcast %67 : vector<1x32xf32> to vector<8x32xf32>
    %69 = arith.addf %66, %68 : vector<8x32xf32>
    %cst_31 = arith.constant 0.000000e+00 : f32
    %70 = vector.broadcast %cst_31 : f32 to vector<8x32xf32>
    %71 = arith.maximumf %69, %70 : vector<8x32xf32>
    %c192 = arith.constant 192 : index
    %c0_32 = arith.constant 0 : index
    %72 = vector.load %arg2[%c192, %c0_32] : memref<336x128xf32, #tpu.memory_space<vmem>>, vector<32x16xf32>
    %cst_33 = arith.constant dense<0.000000e+00> : vector<8x16xf32>
    %73 = tpu.matmul %71, %72, %cst_33 {dimension_numbers = #tpu.dot_dimension_numbers<[1], [0], [0], [1], [0, 0, 1, 1], [], []>} : vector<8x32xf32>, vector<32x16xf32>, vector<8x16xf32> -> vector<8x16xf32>
    %c7 = arith.constant 7 : index
    %c0_34 = arith.constant 0 : index
    %74 = vector.load %arg3[%c7, %c0_34] : memref<16x128xf32, #tpu.memory_space<vmem>>, vector<1x16xf32>
    %75 = vector.broadcast %74 : vector<1x16xf32> to vector<8x16xf32>
    %76 = arith.addf %73, %75 : vector<8x16xf32>
    %77 = vector.extract_strided_slice %76 {offsets = [0, 0], sizes = [8, 8], strides = [1, 1]} : vector<8x16xf32> to vector<8x8xf32>
    %78 = vector.extract_strided_slice %76 {offsets = [0, 8], sizes = [8, 8], strides = [1, 1]} : vector<8x16xf32> to vector<8x8xf32>
    %cst_35 = arith.constant 5.000000e-01 : f32
    %79 = vector.broadcast %cst_35 : f32 to vector<8x8xf32>
    %80 = arith.mulf %79, %78 : vector<8x8xf32>
    %81 = math.exp %80 : vector<8x8xf32>
    %82 = arith.mulf %3, %81 : vector<8x8xf32>
    %83 = arith.addf %77, %82 : vector<8x8xf32>
    %c8_36 = arith.constant 8 : index
    %c0_37 = arith.constant 0 : index
    %84 = vector.load %arg3[%c8_36, %c0_37] : memref<16x128xf32, #tpu.memory_space<vmem>>, vector<1x32xf32>
    %85 = vector.extract_strided_slice %83 {offsets = [0, 0], sizes = [8, 1], strides = [1, 1]} : vector<8x8xf32> to vector<8x1xf32>
    %c224 = arith.constant 224 : index
    %c0_38 = arith.constant 0 : index
    %86 = vector.load %arg2[%c224, %c0_38] : memref<336x128xf32, #tpu.memory_space<vmem>>, vector<1x32xf32>
    %87 = vector.broadcast %85 : vector<8x1xf32> to vector<8x32xf32>
    %88 = vector.broadcast %86 : vector<1x32xf32> to vector<8x32xf32>
    %89 = arith.mulf %87, %88 : vector<8x32xf32>
    %90 = vector.broadcast %84 : vector<1x32xf32> to vector<8x32xf32>
    %91 = arith.addf %90, %89 : vector<8x32xf32>
    %92 = vector.extract_strided_slice %83 {offsets = [0, 1], sizes = [8, 1], strides = [1, 1]} : vector<8x8xf32> to vector<8x1xf32>
    %c225 = arith.constant 225 : index
    %c0_39 = arith.constant 0 : index
    %93 = vector.load %arg2[%c225, %c0_39] : memref<336x128xf32, #tpu.memory_space<vmem>>, vector<1x32xf32>
    %94 = vector.broadcast %92 : vector<8x1xf32> to vector<8x32xf32>
    %95 = vector.broadcast %93 : vector<1x32xf32> to vector<8x32xf32>
    %96 = arith.mulf %94, %95 : vector<8x32xf32>
    %97 = arith.addf %91, %96 : vector<8x32xf32>
    %98 = vector.extract_strided_slice %83 {offsets = [0, 2], sizes = [8, 1], strides = [1, 1]} : vector<8x8xf32> to vector<8x1xf32>
    %c226 = arith.constant 226 : index
    %c0_40 = arith.constant 0 : index
    %99 = vector.load %arg2[%c226, %c0_40] : memref<336x128xf32, #tpu.memory_space<vmem>>, vector<1x32xf32>
    %100 = vector.broadcast %98 : vector<8x1xf32> to vector<8x32xf32>
    %101 = vector.broadcast %99 : vector<1x32xf32> to vector<8x32xf32>
    %102 = arith.mulf %100, %101 : vector<8x32xf32>
    %103 = arith.addf %97, %102 : vector<8x32xf32>
    %104 = vector.extract_strided_slice %83 {offsets = [0, 3], sizes = [8, 1], strides = [1, 1]} : vector<8x8xf32> to vector<8x1xf32>
    %c227 = arith.constant 227 : index
    %c0_41 = arith.constant 0 : index
    %105 = vector.load %arg2[%c227, %c0_41] : memref<336x128xf32, #tpu.memory_space<vmem>>, vector<1x32xf32>
    %106 = vector.broadcast %104 : vector<8x1xf32> to vector<8x32xf32>
    %107 = vector.broadcast %105 : vector<1x32xf32> to vector<8x32xf32>
    %108 = arith.mulf %106, %107 : vector<8x32xf32>
    %109 = arith.addf %103, %108 : vector<8x32xf32>
    %110 = vector.extract_strided_slice %83 {offsets = [0, 4], sizes = [8, 1], strides = [1, 1]} : vector<8x8xf32> to vector<8x1xf32>
    %c228 = arith.constant 228 : index
    %c0_42 = arith.constant 0 : index
    %111 = vector.load %arg2[%c228, %c0_42] : memref<336x128xf32, #tpu.memory_space<vmem>>, vector<1x32xf32>
    %112 = vector.broadcast %110 : vector<8x1xf32> to vector<8x32xf32>
    %113 = vector.broadcast %111 : vector<1x32xf32> to vector<8x32xf32>
    %114 = arith.mulf %112, %113 : vector<8x32xf32>
    %115 = arith.addf %109, %114 : vector<8x32xf32>
    %116 = vector.extract_strided_slice %83 {offsets = [0, 5], sizes = [8, 1], strides = [1, 1]} : vector<8x8xf32> to vector<8x1xf32>
    %c229 = arith.constant 229 : index
    %c0_43 = arith.constant 0 : index
    %117 = vector.load %arg2[%c229, %c0_43] : memref<336x128xf32, #tpu.memory_space<vmem>>, vector<1x32xf32>
    %118 = vector.broadcast %116 : vector<8x1xf32> to vector<8x32xf32>
    %119 = vector.broadcast %117 : vector<1x32xf32> to vector<8x32xf32>
    %120 = arith.mulf %118, %119 : vector<8x32xf32>
    %121 = arith.addf %115, %120 : vector<8x32xf32>
    %122 = vector.extract_strided_slice %83 {offsets = [0, 6], sizes = [8, 1], strides = [1, 1]} : vector<8x8xf32> to vector<8x1xf32>
    %c230 = arith.constant 230 : index
    %c0_44 = arith.constant 0 : index
    %123 = vector.load %arg2[%c230, %c0_44] : memref<336x128xf32, #tpu.memory_space<vmem>>, vector<1x32xf32>
    %124 = vector.broadcast %122 : vector<8x1xf32> to vector<8x32xf32>
    %125 = vector.broadcast %123 : vector<1x32xf32> to vector<8x32xf32>
    %126 = arith.mulf %124, %125 : vector<8x32xf32>
    %127 = arith.addf %121, %126 : vector<8x32xf32>
    %128 = vector.extract_strided_slice %83 {offsets = [0, 7], sizes = [8, 1], strides = [1, 1]} : vector<8x8xf32> to vector<8x1xf32>
    %c231 = arith.constant 231 : index
    %c0_45 = arith.constant 0 : index
    %129 = vector.load %arg2[%c231, %c0_45] : memref<336x128xf32, #tpu.memory_space<vmem>>, vector<1x32xf32>
    %130 = vector.broadcast %128 : vector<8x1xf32> to vector<8x32xf32>
    %131 = vector.broadcast %129 : vector<1x32xf32> to vector<8x32xf32>
    %132 = arith.mulf %130, %131 : vector<8x32xf32>
    %133 = arith.addf %127, %132 : vector<8x32xf32>
    %134 = vector.extract_strided_slice %2 {offsets = [0, 0], sizes = [8, 1], strides = [1, 1]} : vector<8x2xf32> to vector<8x1xf32>
    %c232 = arith.constant 232 : index
    %c0_46 = arith.constant 0 : index
    %135 = vector.load %arg2[%c232, %c0_46] : memref<336x128xf32, #tpu.memory_space<vmem>>, vector<1x32xf32>
    %136 = vector.broadcast %134 : vector<8x1xf32> to vector<8x32xf32>
    %137 = vector.broadcast %135 : vector<1x32xf32> to vector<8x32xf32>
    %138 = arith.mulf %136, %137 : vector<8x32xf32>
    %139 = arith.addf %133, %138 : vector<8x32xf32>
    %140 = vector.extract_strided_slice %2 {offsets = [0, 1], sizes = [8, 1], strides = [1, 1]} : vector<8x2xf32> to vector<8x1xf32>
    %c233 = arith.constant 233 : index
    %c0_47 = arith.constant 0 : index
    %141 = vector.load %arg2[%c233, %c0_47] : memref<336x128xf32, #tpu.memory_space<vmem>>, vector<1x32xf32>
    %142 = vector.broadcast %140 : vector<8x1xf32> to vector<8x32xf32>
    %143 = vector.broadcast %141 : vector<1x32xf32> to vector<8x32xf32>
    %144 = arith.mulf %142, %143 : vector<8x32xf32>
    %145 = arith.addf %139, %144 : vector<8x32xf32>
    %cst_48 = arith.constant 0.000000e+00 : f32
    %146 = vector.broadcast %cst_48 : f32 to vector<8x32xf32>
    %147 = arith.maximumf %145, %146 : vector<8x32xf32>
    %c240 = arith.constant 240 : index
    %c0_49 = arith.constant 0 : index
    %148 = vector.load %arg2[%c240, %c0_49] : memref<336x128xf32, #tpu.memory_space<vmem>>, vector<32x32xf32>
    %cst_50 = arith.constant dense<0.000000e+00> : vector<8x32xf32>
    %149 = tpu.matmul %147, %148, %cst_50 {dimension_numbers = #tpu.dot_dimension_numbers<[1], [0], [0], [1], [0, 0, 1, 1], [], []>} : vector<8x32xf32>, vector<32x32xf32>, vector<8x32xf32> -> vector<8x32xf32>
    %c9 = arith.constant 9 : index
    %c0_51 = arith.constant 0 : index
    %150 = vector.load %arg3[%c9, %c0_51] : memref<16x128xf32, #tpu.memory_space<vmem>>, vector<1x32xf32>
    %151 = vector.broadcast %150 : vector<1x32xf32> to vector<8x32xf32>
    %152 = arith.addf %149, %151 : vector<8x32xf32>
    %cst_52 = arith.constant 0.000000e+00 : f32
    %153 = vector.broadcast %cst_52 : f32 to vector<8x32xf32>
    %154 = arith.maximumf %152, %153 : vector<8x32xf32>
    %c272 = arith.constant 272 : index
    %c0_53 = arith.constant 0 : index
    %155 = vector.load %arg2[%c272, %c0_53] : memref<336x128xf32, #tpu.memory_space<vmem>>, vector<32x32xf32>
    %cst_54 = arith.constant dense<0.000000e+00> : vector<8x32xf32>
    %156 = tpu.matmul %154, %155, %cst_54 {dimension_numbers = #tpu.dot_dimension_numbers<[1], [0], [0], [1], [0, 0, 1, 1], [], []>} : vector<8x32xf32>, vector<32x32xf32>, vector<8x32xf32> -> vector<8x32xf32>
    %c10 = arith.constant 10 : index
    %c0_55 = arith.constant 0 : index
    %157 = vector.load %arg3[%c10, %c0_55] : memref<16x128xf32, #tpu.memory_space<vmem>>, vector<1x32xf32>
    %158 = vector.broadcast %157 : vector<1x32xf32> to vector<8x32xf32>
    %159 = arith.addf %156, %158 : vector<8x32xf32>
    %cst_56 = arith.constant 0.000000e+00 : f32
    %160 = vector.broadcast %cst_56 : f32 to vector<8x32xf32>
    %161 = arith.maximumf %159, %160 : vector<8x32xf32>
    %c304 = arith.constant 304 : index
    %c0_57 = arith.constant 0 : index
    %162 = vector.load %arg2[%c304, %c0_57] : memref<336x128xf32, #tpu.memory_space<vmem>>, vector<32x16xf32>
    %cst_58 = arith.constant dense<0.000000e+00> : vector<8x16xf32>
    %163 = tpu.matmul %161, %162, %cst_58 {dimension_numbers = #tpu.dot_dimension_numbers<[1], [0], [0], [1], [0, 0, 1, 1], [], []>} : vector<8x32xf32>, vector<32x16xf32>, vector<8x16xf32> -> vector<8x16xf32>
    %c11 = arith.constant 11 : index
    %c0_59 = arith.constant 0 : index
    %164 = vector.load %arg3[%c11, %c0_59] : memref<16x128xf32, #tpu.memory_space<vmem>>, vector<1x16xf32>
    %165 = vector.broadcast %164 : vector<1x16xf32> to vector<8x16xf32>
    %166 = arith.addf %163, %165 : vector<8x16xf32>
    %cst_60 = arith.constant 0.000000e+00 : f32
    %167 = vector.broadcast %cst_60 : f32 to vector<8x80xf32>
    %168 = tpu.concatenate %166, %76, %38, %167 in 1 : vector<8x16xf32>, vector<8x16xf32>, vector<8x16xf32>, vector<8x80xf32> -> vector<8x128xf32>
    %c0_61 = arith.constant 0 : index
    %c0_62 = arith.constant 0 : index
    %169 = vector.load %arg4[%c0_61, %c0_62] : memref<8x128xf32, #tpu.memory_space<vmem>>, vector<8x128xf32>
    tpu.vector_store %arg4[%c0_61, %c0_62], %168 {strides = array<i32>} : memref<8x128xf32, #tpu.memory_space<vmem>>, vector<8x128xf32>,
    return
  }
  func.func @transform_0(%arg0: i32) -> (i32, i32) {
    %c0_i32 = arith.constant 0 : i32
    %c0_i32_0 = arith.constant 0 : i32
    return %arg0, %c0_i32 : i32, i32
  }
  func.func @transform_1(%arg0: i32) -> (i32, i32) {
    %c0_i32 = arith.constant 0 : i32
    %c0_i32_0 = arith.constant 0 : i32
    %c0_i32_1 = arith.constant 0 : i32
    return %c0_i32, %c0_i32_0 : i32, i32
  }
  func.func @transform_2(%arg0: i32) -> (i32, i32) {
    %c0_i32 = arith.constant 0 : i32
    %c0_i32_0 = arith.constant 0 : i32
    %c0_i32_1 = arith.constant 0 : i32
    return %c0_i32, %c0_i32_0 : i32, i32
  }
  func.func @transform_3(%arg0: i32) -> (i32, i32) {
    %c0_i32 = arith.constant 0 : i32
    %c0_i32_0 = arith.constant 0 : i32
    return %arg0, %c0_i32 : i32, i32
  }
}

</mosaic_0001>

<bundles_post_ra>
// kernel: tpu_custom_call.1
= control target key start
LH: loop header
LB: loop body
LE: loop exit
PB: predicated region body
PF: predicated region fallthrough
CT: control target
= control target key end

     0   :  { %8 = vsyncpa [#allocation3], 0  ;;  %s756_s0 = inlined_call_operand.hbm [shape: f32[8,128], index: 0, kind: input, shape index: {}]   ;;  %s757_s1 = inlined_call_operand.hbm [shape: f32[336,128], index: 1, kind: input, shape index: {}]   ;;  %s758_s2 = inlined_call_operand.hbm [shape: f32[16,128], index: 2, kind: input, shape index: {}]   ;;  %s759_s3 = inlined_call_operand.hbm [shape: f32[8,128], index: 3, kind: output, shape index: {}]  }
   0x1   :  { %9 = vsyncpa [#allocation6], 0  ;;  %s26_s14 = sshll.u32 %s757_s1, 4  ;;  %s27_s14 = int_to_ptr.hbm [resolvable:$true] %s26_s14 }
   0x2   :  { %10 = vsyncpa [#allocation4], 0  ;;  %s676_s15 = smov [#allocation5]   ;;  %s16_s19 = sshll.u32 %s756_s0, 4  ;;  %s17_s19 = int_to_ptr.hbm [resolvable:$true] %s16_s19 }
   0x3   :  { %s28_s16 = sshll.u32 %s676_s15, 4  ;;  %s677_s20 = smov 128   ;;  %s29_s16 = int_to_ptr.vmem [resolvable:$true] %s28_s16 }
   0x4   :  { %s678_s21 = smov 8   ;;  %s679_s22 = smov [#allocation2]  }
   0x5   :  { %34 = dma.hbm_to_vmem [thread:$0]  %s27_s14, 5376, %s29_s16, [#allocation6], %s677_s20, %s677_s20, %s678_s21  }
   0x6   :  { %s18_s23 = sshll.u32 %s679_s22, 4  ;;  %s39_s26 = sshll.u32 %s758_s2, 4  ;;  %s19_s23 = int_to_ptr.vmem [resolvable:$true] %s18_s23  ;;  %s40_s26 = int_to_ptr.hbm [resolvable:$true] %s39_s26 }
   0x7   :  { %21 = dma.hbm_to_vmem [thread:$0]  %s17_s19, 128, %s19_s23, [#allocation3]  }
   0x8   :  { %s680_s1 = smov [#allocation7]  }
   0x9   :  { %s41_s27 = sshll.u32 %s680_s1, 4  ;;  %s42_s27 = int_to_ptr.vmem [resolvable:$true] %s41_s27 }
   0xa   :  { %47 = dma.hbm_to_vmem [thread:$0]  %s40_s26, 256, %s42_s27, [#allocation6], %s677_s20, %s677_s20, %s678_s21  }
   0xb   :  { %670 = dma.done.wait [#allocation3], 128  }
   0xc   :  { %671 = vsyncadd [#allocation3], 4294967168 }
   0xd   :  { %672 = dma.done.wait [#allocation6], 5632  }
   0xe   :  { %673 = vsyncadd [#allocation6], 4294961664  ;;  %v681_v0 = vmov 16   ;;  %v172_v1 = vld [vmem:[#allocation5 + $0x70] sm:$0xff]  ;;  %v171_v2 = vld [vmem:[#allocation5 + $0x68] sm:$0xff]  ;;  %vm175_vm0 = vcmask 130048  }
   0xf   :  { %535 = vset.pattern.permute.xlu0 %v681_v0  ;;  %v725_v3 = vld [vmem:[#allocation2] sm:$0xff]  ;;  %192 = vmatpush.msra.mxu3 %v172_v1  ;;  %v682_v4 = vmov 17   ;;  %v84_v5 = vld [vmem:[#allocation5 + $0x20] sm:$0xff]  ;;  %v82_v7 = vld [vmem:[#allocation5 + $0x10] sm:$0xff]  ;;  %vm87_vm1 = vcmask 261120   ;;  %s683_s0 = smov 10  }
  0x10   :  { %65 = vperm.xlu0 %535, %v725_v3   ;;  %103 = vmatpush.msra.mxu0 %v84_v5  ;;  %v83_v6 = vld [vmem:[#allocation5 + $0x18] sm:$0xff]  ;;  %v81_v8 = vld [vmem:[#allocation5 + $0x8] sm:$0xff]  ;;  %v209_v10 = vld [vmem:[#allocation5 + $0x90] sm:$0xff]  ;;  %s684_s2 = smov 110   ;;  %s688_s28 = smov 32   ;;  %vm484_vm2 = vcmask 392192  }
  0x11   :  { %193 = vmatpush.msra.mxu3 %v171_v2  ;;  %v210_v9 = vld [vmem:[#allocation5 + $0x98] sm:$0xff]  ;;  %v208_v11 = vld [vmem:[#allocation5 + $0x88] sm:$0xff]  ;;  %v207_v12 = vld [vmem:[#allocation5 + $0x80] sm:$0xff]  ;;  %s694_s29 = smov 16   ;;  %s695_s30 = smov [#allocation8]  }
  0x12   :  { %508 = vmatmul.msk.f32.vlgmr.msra.gmra.mxu3 %vm175_vm0, %v725_v3  ;;  %104 = vmatpush.msra.mxu0 %v83_v6  ;;  %v115_v13 = vld [vmem:[#allocation5 + $0x40] sm:$0xff]  ;;  %v547_v16 = vld [vmem:[#allocation7] ss:$0 sm:$0xff]  ;;  %v548_v24 = vld [vmem:[#allocation5 + $0x78] ss:$0 sm:$0xff]  ;;  %s492_s4 = sshll.u32 %s695_s30, 4  ;;  %s493_s4 = int_to_ptr.vmem [resolvable:$true] %s492_s4 }
  0x13   :  { %228 = vmatpush.msrb.mxu3 %v210_v9  ;;  %133 = vmatpush.msra.mxu1 %v115_v13  ;;  %v546_v14 = vld [vmem:[#allocation5] ss:$0 sm:$0xff]  ;;  %v550_v18 = vld [vmem:[#allocation5 + $0x1] ss:$0 sm:$0xff]  ;;  %v551_v25 = vld [vmem:[#allocation5 + $0x79] ss:$0 sm:$0xff] }
  0x14   :  { %105 = vmatpush.msra.mxu0 %v82_v7  ;;  %v553_v26 = vld [vmem:[#allocation7 + $0x4] ss:$0 sm:$0xff]  ;;  %v114_v34 = vld [vmem:[#allocation5 + $0x38] sm:$0xff]  ;;  %v112_v36 = vld [vmem:[#allocation5 + $0x28] sm:$0xff]  ;;  %s494_s7 = sshll.u32 %s759_s3, 4  ;;  %s495_s7 = int_to_ptr.hbm [resolvable:$true] %s494_s7 }
  0x15   :  { %229 = vmatpush.msrb.mxu3 %v209_v10  ;;  %v113_v35 = vld [vmem:[#allocation5 + $0x30] sm:$0xff]  ;;  %134 = vmatpush.msra.mxu1 %v114_v34  ;;  %v240_v37 = vld [vmem:[#allocation5 + $0xb8] sm:$0xff]  ;;  %v238_v39 = vld [vmem:[#allocation5 + $0xa8] sm:$0xff]  ;;  %v685_v10 = vmov 2  }
  0x16   :  { %106 = vmatpush.msra.mxu0 %v81_v8  ;;  %v239_v38 = vld [vmem:[#allocation5 + $0xb0] sm:$0xff]  ;;  %v237_v40 = vld [vmem:[#allocation5 + $0xa0] sm:$0xff]  ;;  %v144_v50 = vld [vmem:[#allocation5 + $0x58] sm:$0xff]  ;;  %539 = vset.pattern.permute.xlu1 %v685_v10 }
  0x17   :  { %230 = vmatpush.msrb.mxu3 %v208_v11  ;;  %135 = vmatpush.msra.mxu1 %v113_v35  ;;  %v145_v41 = vld [vmem:[#allocation5 + $0x60] sm:$0xff]  ;;  %v554_v42 = vld [vmem:[#allocation7 + $0x1] ss:$0 sm:$0xff]  ;;  %v555_v46 = vld [vmem:[#allocation7 + $0x5] ss:$0 sm:$0xff]  ;;  %v686_v11 = vmov 0  }
  0x18   :  { %536 = vset.pattern.permute.xlu0 %v682_v4  ;;  %258 = vmatpush.msrb.mxu0 %v240_v37  ;;  %v143_v51 = vld [vmem:[#allocation5 + $0x50] sm:$0xff]  ;;  %v142_v52 = vld [vmem:[#allocation5 + $0x48] sm:$0xff]  ;;  %v270_v53 = vld [vmem:[#allocation5 + $0xd8] sm:$0xff] }
  0x19   :  { %74 = vperm.xlu0 %536, %v725_v3   ;;  %231 = vmatpush.msrb.mxu3 %v207_v12  ;;  %v269_v54 = vld [vmem:[#allocation5 + $0xd0] sm:$0xff]  ;;  %v268_v55 = vld [vmem:[#allocation5 + $0xc8] sm:$0xff]  ;;  %v267_v56 = vld [vmem:[#allocation5 + $0xc0] sm:$0xff]  ;;  %v687_v12 = vmov 4  }
  0x1a   :  { %136 = vmatpush.msra.mxu1 %v112_v36  ;;  %259 = vmatpush.msrb.mxu0 %v239_v38  ;;  %v556_v57 = vld [vmem:[#allocation7 + $0x2] ss:$0 sm:$0xff]  ;;  %v557_v61 = vld [vmem:[#allocation7 + $0x6] ss:$0 sm:$0xff]  ;;  %v559_v1 = vld [vmem:[#allocation7 + $0x7] ss:$0 sm:$0xff] }
  0x1b   :  { %163 = vmatpush.msra.mxu2 %v145_v41  ;;  %537 = vset.pattern.permute.xlu2 %v686_v11  ;;  %v565_v34 = vld [vmem:[#allocation5 + $0xe2] ss:$0 sm:$0xff]  ;;  %v418_v35 = vld [vmem:[#allocation5 + $0x128] sm:$0xff]  ;;  %v569_v11 = vld [vmem:[#allocation7 + $0x9] ss:$0 sm:$0xff] }
  0x1c   :  { %260 = vmatpush.msrb.mxu0 %v238_v39  ;;  %288 = vmatpush.msrb.mxu1 %v270_v53  ;;  %v417_v36 = vld [vmem:[#allocation5 + $0x120] sm:$0xff] }
  0x1d   :  { %164 = vmatpush.msra.mxu2 %v144_v50  ;;  %436 = vmatpush.msra.mxu3 %v418_v35  ;;  %v566_v53 = vld [vmem:[#allocation5 + $0xe6] ss:$0 sm:$0xff] }
  0x1e   :  { %261 = vmatpush.msrb.mxu0 %v237_v40  ;;  %289 = vmatpush.msrb.mxu1 %v269_v54  ;;  %v447_v10 = vld [vmem:[#allocation5 + $0x140] sm:$0xff] }
  0x1f   :  { %165 = vmatpush.msra.mxu2 %v143_v51  ;;  %437 = vmatpush.msra.mxu3 %v417_v36 }
  0x20   :  { %290 = vmatpush.msrb.mxu1 %v268_v55 }
  0x21   :  { %166 = vmatpush.msra.mxu2 %v142_v52  ;;  %541 = vset.pattern.permute.xlu0 %v687_v12 }
  0x22   :  { %291 = vmatpush.msrb.mxu1 %v267_v56 }
  0x82   :  { %v731_v15 = vpop.permute.xlu0 %65 }
  0x83   :  { %v69_v17 = vmul.f32 %v546_v14, %v731_v15  ;;  %v200_v28 = vmul.f32 %v548_v24, %v731_v15 }
  0x85   :  { %v71_v19 = vadd.f32 %v547_v16, %v69_v17  ;;  %v558_v16 = vld [vmem:[#allocation7 + $0x3] ss:$0 sm:$0xff] }
  0x8b   :  { %v734_v20 = vpop.permute.xlu0 %74 }
  0x8c   :  { %v78_v21 = vmul.f32 %v550_v18, %v734_v20  ;;  %v204_v29 = vmul.f32 %v551_v25, %v734_v20  ;;  %v388_v25 = vld [vmem:[#allocation5 + $0x108] sm:$0xff] }
  0x8d   :  { %406 = vmatpush.msrb.mxu2 %v388_v25 }
  0x8e   :  { %v79_v22 = vadd.f32 %v78_v21, %v71_v19  ;;  %v689_v19 = vmov 5   ;;  %v691_v21 = vmov 7  }
  0x90   :  { %v80_v23 = vmax.f32 %v79_v22, 0.0  ;;  %v692_v22 = vmov 3  }
  0x92   :  { %505 = vmatmul.msk.f32.vlgmr.msra.gmra.mxu0 %vm87_vm1, %v80_v23  ;;  %v693_v23 = vmov 6  }
  0x95   :  { %v195_v27 = vpop.f32.mrf.mxu3 }
  0x96   :  { %v196_v30 = vadd.f32 %v553_v26, %v195_v27  ;;  %v387_v26 = vld [vmem:[#allocation5 + $0x100] sm:$0xff] }
  0x97   :  { %v560_v27 = vld [vmem:[#allocation5 + $0xe0] ss:$0 sm:$0xff]  ;;  %407 = vmatpush.msrb.mxu2 %v387_v26 }
  0x98   :  { %v201_v31 = vadd.f32 %v200_v28, %v196_v30  ;;  %v562_v30 = vld [vmem:[#allocation5 + $0xe1] ss:$0 sm:$0xff] }
  0x9a   :  { %v205_v32 = vadd.f32 %v204_v29, %v201_v31  ;;  %v386_v29 = vld [vmem:[#allocation5 + $0xf8] sm:$0xff]  ;;  %v385_v31 = vld [vmem:[#allocation5 + $0xf0] sm:$0xff] }
  0x9b   :  { %408 = vmatpush.msrb.mxu2 %v386_v29 }
  0x9c   :  { %v206_v33 = vmax.f32 %v205_v32, 0.0  ;;  %v561_v32 = vld [vmem:[#allocation7 + $0x8] ss:$0 sm:$0xff] }
  0x9d   :  { %409 = vmatpush.msrb.mxu2 %v385_v31 }
  0x9e   :  { %509 = vmatmul.msk.f32.vlgmr.msrb.gmra.mxu3 %vm87_vm1, %v206_v33 }
 0x10f   :  { %v108_v43 = vpop.f32.mrf.mxu0 }
 0x110   :  { %v109_v44 = vadd.f32 %v554_v42, %v108_v43  ;;  %v563_v42 = vld [vmem:[#allocation5 + $0xe3] ss:$0 sm:$0xff] }
 0x112   :  { %v111_v45 = vmax.f32 %v109_v44, 0.0 }
 0x114   :  { %506 = vmatmul.msk.f32.vlgmr.msra.gmra.mxu1 %vm87_vm1, %v111_v45 }
 0x121   :  { %v233_v47 = vpop.f32.mrf.mxu3 }
 0x122   :  { %v234_v48 = vadd.f32 %v555_v46, %v233_v47  ;;  %v564_v46 = vld [vmem:[#allocation5 + $0xe4] ss:$0 sm:$0xff]  ;;  %v567_v47 = vld [vmem:[#allocation5 + $0xe5] ss:$0 sm:$0xff] }
 0x124   :  { %v236_v49 = vmax.f32 %v234_v48, 0.0 }
 0x126   :  { %510 = vmatmul.msk.f32.vlgmr.msrb.gmra.mxu0 %vm87_vm1, %v236_v49 }
 0x191   :  { %v138_v58 = vpop.f32.mrf.mxu1 }
 0x192   :  { %v139_v59 = vadd.f32 %v556_v57, %v138_v58  ;;  %v568_v57 = vld [vmem:[#allocation5 + $0xe7] ss:$0 sm:$0xff]  ;;  %v549_v58 = vld [vmem:[#allocation5 + $0xe8] ss:$0 sm:$0xff] }
 0x194   :  { %v141_v60 = vmax.f32 %v139_v59, 0.0 }
 0x196   :  { %507 = vmatmul.msk.f32.vlgmr.msra.gmra.mxu2 %vm87_vm1, %v141_v60 }
 0x1a3   :  { %v263_v62 = vpop.f32.mrf.mxu0 }
 0x1a4   :  { %v264_v63 = vadd.f32 %v557_v61, %v263_v62  ;;  %v552_v61 = vld [vmem:[#allocation5 + $0xe9] ss:$0 sm:$0xff] }
 0x1a6   :  { %v266_v0 = vmax.f32 %v264_v63, 0.0 }
 0x1a8   :  { %511 = vmatmul.msk.f32.vlgmr.msrb.gmra.mxu1 %vm87_vm1, %v266_v0  ;;  %v378_v0 = vmul.f32 %v549_v58, %v731_v15 }
 0x219   :  { %v168_v17 = vpop.f32.mrf.mxu2 }
 0x21a   :  { %v169_v18 = vadd.f32 %v558_v16, %v168_v17  ;;  %v570_v16 = vld [vmem:[#allocation7 + $0xa] ss:$0 sm:$0xff] }
 0x225   :  { %v293_v2 = vpop.f32.mrf.mxu1 }
 0x226   :  { %v294_v4 = vadd.f32 %v559_v1, %v293_v2  ;;  %v382_v2 = vmul.f32 %v552_v61, %v734_v20  ;;  %v446_v20 = vld [vmem:[#allocation5 + $0x138] sm:$0xff] }
 0x228   :  { %v296_v5 = vmul.f32 0.5, %v294_v4 }
 0x22a   :  { %v297_v6 = vmul.f32 1.442695, %v296_v5 }
 0x22c   :  { %572 = vpow2.f32 %v297_v6 }
 0x232   :  { %v573_v7 = vpop.eup %572 }
 0x233   :  { %300 = vrot.lane.b32.xlu1 %v573_v7, %s683_s0  ;;  %v416_v7 = vld [vmem:[#allocation5 + $0x118] sm:$0xff] }
 0x234   :  { %438 = vmatpush.msra.mxu3 %v416_v7 }
 0x2a5   :  { %v301_v8 = vpop.permute.xlu1 %300 }
 0x2a6   :  { %v303_v9 = vmul.f32 %v301_v8, %v725_v3  ;;  %v690_v3 = vmov 1   ;;  %v415_v8 = vld [vmem:[#allocation5 + $0x110] sm:$0xff] }
 0x2a7   :  { %439 = vmatpush.msra.mxu3 %v415_v8 }
 0x2a8   :  { %305 = vrot.lane.b32.xlu1 %v303_v9, %s684_s2  ;;  %v448_v9 = vld [vmem:[#allocation5 + $0x148] sm:$0xff] }
 0x2a9   :  { %466 = vmatpush.msra.mxu0 %v448_v9 }
 0x2ab   :  { %467 = vmatpush.msra.mxu0 %v447_v10 }
 0x2ad   :  { %468 = vmatpush.msra.mxu0 %v446_v20 }
 0x31a   :  { %v306_v13 = vpop.permute.xlu1 %305 }
 0x31b   :  { %v308_v14 = vadd.f32 %v306_v13, %v294_v4 }
 0x31d   :  { %346 = vperm.xlu0 %541, %v308_v14   ;;  %330 = vperm.xlu1 %539, %v308_v14  }
 0x31e   :  { %313 = vperm.xlu2 %537, %v308_v14  }
 0x325   :  { %479 = vrot.lane.b32.xlu0 %v169_v18, %s688_s28  ;;  %542 = vset.pattern.permute.xlu1 %v689_v19 }
 0x326   :  { %538 = vset.pattern.permute.xlu2 %v690_v3  ;;  %354 = vperm.xlu1 %542, %v308_v14   ;;  %v571_v3 = vld [vmem:[#allocation7 + $0xb] ss:$0 sm:$0xff] }
 0x327   :  { %322 = vperm.xlu2 %538, %v308_v14   ;;  %545 = vset.pattern.permute.xlu0 %v691_v21 }
 0x32e   :  { %544 = vset.pattern.permute.xlu1 %v691_v21 }
 0x32f   :  { %540 = vset.pattern.permute.xlu2 %v692_v22  ;;  %370 = vperm.xlu1 %544, %v308_v14  }
 0x330   :  { %338 = vperm.xlu2 %540, %v308_v14  }
 0x338   :  { %543 = vset.pattern.permute.xlu2 %v693_v23 }
 0x339   :  { %362 = vperm.xlu2 %543, %v308_v14   ;;  %v445_v14 = vld [vmem:[#allocation5 + $0x130] sm:$0xff] }
 0x33a   :  { %469 = vmatpush.msra.mxu0 %v445_v14 }
 0x341   :  { %475 = vrot.lane.b32.xlu2 %v294_v4, %s694_s29 }
 0x378   :  { %v314_v24 = vpop.permute.xlu2 %313 }
 0x379   :  { %v317_v33 = vmul.f32 %v560_v27, %v314_v24 }
 0x37b   :  { %v319_v39 = vadd.f32 %v561_v32, %v317_v33 }
 0x381   :  { %v323_v28 = vpop.permute.xlu2 %322 }
 0x382   :  { %v326_v37 = vmul.f32 %v562_v30, %v323_v28 }
 0x384   :  { %v327_v41 = vadd.f32 %v326_v37, %v319_v39 }
 0x38a   :  { %v339_v43 = vpop.permute.xlu2 %338 }
 0x38b   :  { %v342_v45 = vmul.f32 %v563_v42, %v339_v43 }
 0x38f   :  { %v331_v38 = vpop.permute.xlu1 %330  ;;  %v347_v48 = vpop.permute.xlu0 %346 }
 0x390   :  { %v334_v40 = vmul.f32 %v565_v34, %v331_v38  ;;  %v350_v51 = vmul.f32 %v564_v46, %v347_v48 }
 0x392   :  { %v335_v44 = vadd.f32 %v334_v40, %v327_v41 }
 0x393   :  { %v363_v55 = vpop.permute.xlu2 %362 }
 0x394   :  { %v343_v49 = vadd.f32 %v342_v45, %v335_v44  ;;  %v366_v59 = vmul.f32 %v566_v53, %v363_v55 }
 0x396   :  { %v351_v54 = vadd.f32 %v350_v51, %v343_v49 }
 0x397   :  { %v480_v24 = vpop.permute.xlu0 %479 }
 0x398   :  { %v355_v50 = vpop.permute.xlu1 %354 }
 0x399   :  { %v358_v52 = vmul.f32 %v567_v47, %v355_v50 }
 0x39b   :  { %v359_v56 = vadd.f32 %v358_v52, %v351_v54  ;;  %v476_v23 = vpop.permute.xlu2 %475 }
 0x39d   :  { %v367_v62 = vadd.f32 %v366_v59, %v359_v56 }
 0x3a1   :  { %v371_v60 = vpop.permute.xlu1 %370 }
 0x3a2   :  { %v374_v63 = vmul.f32 %v568_v57, %v371_v60 }
 0x3a4   :  { %v375_v1 = vadd.f32 %v374_v63, %v367_v62 }
 0x3a6   :  { %v379_v4 = vadd.f32 %v378_v0, %v375_v1 }
 0x3a8   :  { %v383_v5 = vadd.f32 %v382_v2, %v379_v4 }
 0x3aa   :  { %v384_v6 = vmax.f32 %v383_v5, 0.0 }
 0x3ac   :  { %512 = vmatmul.msk.f32.vlgmr.msrb.gmra.mxu2 %vm87_vm1, %v384_v6 }
 0x42f   :  { %v411_v12 = vpop.f32.mrf.mxu2 }
 0x430   :  { %v412_v13 = vadd.f32 %v569_v11, %v411_v12 }
 0x432   :  { %v414_v15 = vmax.f32 %v412_v13, 0.0 }
 0x434   :  { %513 = vmatmul.msk.f32.vlgmr.msra.gmra.mxu3 %vm87_vm1, %v414_v15 }
 0x4b7   :  { %v441_v17 = vpop.f32.mrf.mxu3 }
 0x4b8   :  { %v442_v18 = vadd.f32 %v570_v16, %v441_v17 }
 0x4ba   :  { %v444_v19 = vmax.f32 %v442_v18, 0.0 }
 0x4bc   :  { %514 = vmatmul.msk.f32.vlgmr.msra.gmra.mxu0 %vm87_vm1, %v444_v19 }
 0x539   :  { %v471_v21 = vpop.f32.mrf.mxu0 }
 0x53a   :  { %v472_v22 = vadd.f32 %v571_v3, %v471_v21 }
 0x53c   :  { %v482_v25 = vsel %vm175_vm0, %v472_v22, %v476_v23 }
 0x53d   :  { %v483_v26 = vsel %vm87_vm1, %v482_v25, %v480_v24 }
 0x53e   :  { %v485_v27 = vsel %vm484_vm2, %v483_v26, 0.0 }
 0x53f   :  { %486 = vst [vmem:[#allocation8] sm:$0xff] %v485_v27 }
 0x540   :  { %497 = dma.vmem_to_hbm [thread:$0]  %s493_s4, 128, %s495_s7, [#allocation4]  }
 0x541   :  { %674 = dma.done.wait [#allocation4], 128  }
 0x542   :  { %675 = vsyncadd [#allocation4], 4294967168 }
 0x543   :  { %502 = vsyncpa [#allocation3], 1 }
 0x544   :  { %503 = vsyncpa [#allocation6], 1 }
 0x545   :  { %504 = vsyncpa [#allocation4], 1 }

</bundles_post_ra>
